<compile_context>
chip_gen: v6e
topology: v6e:2x2x1
jax: 0.10.0
libtpu: 0.0.40
codegen_flags: <defaults>
</compile_context>

<pallas_src>
import functools
import math

import jax
import jax.numpy as jnp
from jax.experimental import pallas as pl
from jax.experimental.pallas import tpu as pltpu


def _round_up(x: int, m: int) -> int:
    return ((x + m - 1) // m) * m


def _add_norm_kernel(params_ref, x_ref, o_ref, *, eps: float, d_model: int):
    """addNormLayer on one tile of rows.

    params_ref : SMEM ref, shape (2,) f32  -> [alpha, bias]
    x_ref      : VMEM ref, shape (tr, d_model)
    o_ref      : VMEM ref, shape (tr, d_model)
    """
    x = x_ref[...].astype(jnp.float32)

    mean = jnp.mean(x, axis=-1, keepdims=True)
    xc = x - mean
    # torch.std defaults to the unbiased estimator (divide by n-1).
    var = jnp.sum(xc * xc, axis=-1, keepdims=True) / float(d_model - 1)
    std = jnp.sqrt(var)

    alpha = params_ref[0]
    bias = params_ref[1]

    # One tile-wide affine transform, one dense full-tile store.
    o_ref[...] = (alpha * xc / (std + eps) + bias).astype(o_ref.dtype)


def add_norm_layer(x, alpha, bias, *, eps: float = 1e-6, block_rows: int = 256):
    """Pallas equivalent of addNormLayer.forward.

    x           : float [..., d_model]
    alpha, bias : float scalars / shape-(1,) parameters
    """
    orig_shape = x.shape
    d_model = orig_shape[-1]
    num_rows = int(math.prod(orig_shape[:-1]))

    x2 = x.reshape(num_rows, d_model)

    # Large lane-dense tile; second-to-last block dim must be a multiple of 8.
    tr = min(block_rows, _round_up(num_rows, 8))
    padded_rows = _round_up(num_rows, tr)
    if padded_rows != num_rows:
        x2 = jnp.pad(x2, ((0, padded_rows - num_rows), (0, 0)))

    params = jnp.concatenate(
        [jnp.ravel(alpha).astype(jnp.float32), jnp.ravel(bias).astype(jnp.float32)]
    )

    kernel = functools.partial(_add_norm_kernel, eps=float(eps), d_model=d_model)

    out = pl.pallas_call(
        kernel,
        out_shape=jax.ShapeDtypeStruct((padded_rows, d_model), x.dtype),
        grid=(padded_rows // tr,),
        in_specs=[
            # Scalar parameters: whole (2,) array resident in SMEM.
            pl.BlockSpec(memory_space=pltpu.MemorySpace.SMEM),
            pl.BlockSpec((tr, d_model), lambda i: (i, 0)),
        ],
        out_specs=pl.BlockSpec((tr, d_model), lambda i: (i, 0)),
        compiler_params=pltpu.CompilerParams(
            dimension_semantics=("parallel",)  # independent row tiles -> megacore on v7x
        ),
    )(params, x2)

    if padded_rows != num_rows:
        out = out[:num_rows]
    return out.reshape(orig_shape)


def decoder_forward(
    x,
    encoder_output,
    src_mask,
    target_mask,
    layers=(),
    *,
    norm_alpha,
    norm_bias,
    eps: float = 1e-6,
):
    """Pallas equivalent of decoder.forward.

    `layers` is a sequence of JAX callables with signature
    (x, encoder_output, src_mask, target_mask) -> x, mirroring the
    nn.ModuleList passed to the PyTorch decoder.
    """
    # TODO(synk): the decoder-block layers are external nn.Modules not defined
    # in the spec; they are applied here as user-supplied JAX callables
    # (empty sequence in the demo), matching `for layer in self.layers: ...`.
    for layer in layers:
        x = layer(x, encoder_output, src_mask, target_mask)
    return add_norm_layer(x, norm_alpha, norm_bias, eps=eps)


if __name__ == "__main__":
    # Small shapes consistent with the module's forward pass.
    batch, seq, d_model = 2, 8, 128

    key = jax.random.PRNGKey(0)
    k_x, k_enc = jax.random.split(key)

    x = jax.random.normal(k_x, (batch, seq, d_model), dtype=jnp.float32)
    encoder_output = jax.random.normal(k_enc, (batch, seq, d_model), dtype=jnp.float32)
    src_mask = jnp.ones((batch, 1, seq, seq), dtype=jnp.float32)
    target_mask = jnp.tril(jnp.ones((seq, seq), dtype=jnp.float32))[None, None]

    # addNormLayer parameters (nn.Parameter init: alpha = ones(1), bias = zeros(1))
    alpha = jnp.ones((1,), dtype=jnp.float32)
    bias = jnp.zeros((1,), dtype=jnp.float32)

    out = decoder_forward(
        x,
        encoder_output,
        src_mask,
        target_mask,
        layers=(),  # no decoder-block layers defined in the spec
        norm_alpha=alpha,
        norm_bias=bias,
    )
    out = jax.block_until_ready(out)

    # Pure-JAX reference for the implemented path (empty layer list + addNormLayer).
    eps = 1e-6
    mean = jnp.mean(x, axis=-1, keepdims=True)
    std = jnp.std(x, axis=-1, keepdims=True, ddof=1)  # torch unbiased std
    ref = alpha[0] * (x - mean) / (std + eps) + bias[0]

    assert out.shape == (batch, seq, d_model)
    assert jnp.allclose(out, ref, atol=1e-5, rtol=1e-5), "mismatch vs reference"

    print("KERNEL_OK")
</pallas_src>

<mosaic_0001>
module attributes {stable_mosaic.version = 11 : i64} {
  func.func @_add_norm_kernel(%arg0: i32, %arg1: memref<2xf32, #tpu.memory_space<smem>>, %arg2: memref<16x128xf32, #tpu.memory_space<vmem>>, %arg3: memref<16x128xf32, #tpu.memory_space<vmem>>) attributes {dimension_semantics = [#tpu.dimension_semantics<parallel>], iteration_bounds = array<i64: 1>, scalar_prefetch = 0 : i64, scratch_operands = 0 : i64, tpu.core_type = #tpu.core_type<tc>, window_params = [{transform_indices = @transform_0, window_bounds = array<i64: 2>}, {transform_indices = @transform_1, window_bounds = array<i64: 16, 128>}, {transform_indices = @transform_2, window_bounds = array<i64: 16, 128>}]} {
    %c0 = arith.constant 0 : index
    %c0_0 = arith.constant 0 : index
    %0 = vector.load %arg2[%c0, %c0_0] : memref<16x128xf32, #tpu.memory_space<vmem>>, vector<16x128xf32>
    %cst = arith.constant dense<0.000000e+00> : vector<16xf32>
    %1 = vector.multi_reduction <add>, %0, %cst [1] : vector<16x128xf32> to vector<16xf32>
    %2 = vector.shape_cast %1 : vector<16xf32> to vector<16x1xf32>
    %cst_1 = arith.constant 1.280000e+02 : f32
    %3 = vector.broadcast %cst_1 : f32 to vector<16x1xf32>
    %4 = arith.divf %2, %3 : vector<16x1xf32>
    %5 = vector.broadcast %4 : vector<16x1xf32> to vector<16x128xf32>
    %6 = arith.subf %0, %5 : vector<16x128xf32>
    %7 = arith.mulf %6, %6 : vector<16x128xf32>
    %cst_2 = arith.constant dense<0.000000e+00> : vector<16xf32>
    %8 = vector.multi_reduction <add>, %7, %cst_2 [1] : vector<16x128xf32> to vector<16xf32>
    %9 = vector.shape_cast %8 : vector<16xf32> to vector<16x1xf32>
    %cst_3 = arith.constant 1.270000e+02 : f32
    %10 = vector.broadcast %cst_3 : f32 to vector<16x1xf32>
    %11 = arith.divf %9, %10 : vector<16x1xf32>
    %12 = math.sqrt %11 : vector<16x1xf32>
    %c0_4 = arith.constant 0 : index
    %13 = memref.load %arg1[%c0_4] : memref<2xf32, #tpu.memory_space<smem>>
    %c1 = arith.constant 1 : index
    %14 = memref.load %arg1[%c1] : memref<2xf32, #tpu.memory_space<smem>>
    %15 = vector.broadcast %13 : f32 to vector<16x128xf32>
    %16 = arith.mulf %15, %6 : vector<16x128xf32>
    %cst_5 = arith.constant 9.99999997E-7 : f32
    %17 = vector.broadcast %cst_5 : f32 to vector<16x1xf32>
    %18 = arith.addf %12, %17 : vector<16x1xf32>
    %19 = vector.broadcast %18 : vector<16x1xf32> to vector<16x128xf32>
    %20 = arith.divf %16, %19 : vector<16x128xf32>
    %21 = vector.broadcast %14 : f32 to vector<16x128xf32>
    %22 = arith.addf %20, %21 : vector<16x128xf32>
    %c0_6 = arith.constant 0 : index
    %c0_7 = arith.constant 0 : index
    %23 = vector.load %arg3[%c0_6, %c0_7] : memref<16x128xf32, #tpu.memory_space<vmem>>, vector<16x128xf32>
    tpu.vector_store %arg3[%c0_6, %c0_7], %22 {strides = array<i32>} : memref<16x128xf32, #tpu.memory_space<vmem>>, vector<16x128xf32>,
    return
  }
  func.func @transform_0(%arg0: i32) -> i32 {
    %c0_i32 = arith.constant 0 : i32
    %c0_i32_0 = arith.constant 0 : i32
    return %c0_i32 : i32
  }
  func.func @transform_1(%arg0: i32) -> (i32, i32) {
    %c0_i32 = arith.constant 0 : i32
    %c0_i32_0 = arith.constant 0 : i32
    return %arg0, %c0_i32 : i32, i32
  }
  func.func @transform_2(%arg0: i32) -> (i32, i32) {
    %c0_i32 = arith.constant 0 : i32
    %c0_i32_0 = arith.constant 0 : i32
    return %arg0, %c0_i32 : i32, i32
  }
}

</mosaic_0001>

<bundles_post_ra>
// kernel: tpu_custom_call.1
= control target key start
LH: loop header
LB: loop body
LE: loop exit
PB: predicated region body
PF: predicated region fallthrough
CT: control target
= control target key end

     0   :  { %7 = vsyncpa [#allocation5], 0  ;;  %s208_s0 = inlined_call_operand.hbm [shape: f32[2], index: 0, kind: input, shape index: {}]   ;;  %s209_s1 = inlined_call_operand.hbm [shape: f32[16,128], index: 1, kind: input, shape index: {}]   ;;  %s210_s2 = inlined_call_operand.hbm [shape: f32[16,128], index: 2, kind: output, shape index: {}]  }
   0x1   :  { %8 = vsyncpa [#allocation3], 0 }
   0x2   :  { %9 = vsyncpa [#allocation4], 0  ;;  %s173_s9 = smov [#allocation2]   ;;  %s174_s12 = smov [#allocation6]  }
   0x3   :  { %17 = dma.hbm_to_smem %s208_s0, 16, %s173_s9, [#allocation5]  }
   0x4   :  { %s23_s13 = sshll.u32 %s174_s12, 4  ;;  %s24_s13 = int_to_ptr.vmem [resolvable:$true] %s23_s13 }
   0x5   :  { %s135_s14 = scalar_lea.vmem %s24_s13, 256  ;;  %p140_p1 = scmp.lt.s32.totalorder %s24_s13, %s24_s13 }
   0x6   :  { %p136_p0 = scmp.ne.s32.totalorder %s24_s13, %s135_s14  ;;  %p141_p2 = scmp.lt.s32.totalorder %s135_s14, %s135_s14 }
   0x8   :  { %p142_p3 = por %p141_p2, %p140_p1 }
   0xa   :  { %p143_p4 = pnand %p142_p3, %p136_p0 }
   0xc   :  { %146 = shalt.err (!%p143_p4)
}
   0xd   :  { %s175_s15 = smov 128   ;;  %s176_s16 = smov 8  }
   0xe   :  { %29 = dma.hbm_to_vmem [thread:$0]  %s209_s1, 256, %s24_s13, [#allocation3], %s175_s15, %s175_s15, %s176_s16  }
   0xf   :  { %167 = dma.done.wait [#allocation5], 16  }
  0x10   :  { %168 = vsyncadd [#allocation5], 4294967280 }
  0x11   :  { %169 = dma.done.wait [#allocation3], 256  }
  0x12   :  { %170 = vsyncadd [#allocation3], 4294967040 }
  0x13   :  { %36 = sfence }
  0x14   :  { %v37_v0 = vld [vmem:[#allocation6] sm:$0xff]  ;;  %v38_v1 = vld [vmem:[#allocation6 + $0x8] sm:$0xff]  ;;  %s71_s0 = sld [smem:[#allocation2]]  ;;  %s177_s19 = smov [#allocation7]  }
  0x15   :  { %39 = vadd.xlane.f32.xlu0 %v37_v0  ;;  %s105_s1 = sld [smem:[#allocation2 + $0x1]]  ;;  %s92_s20 = sshll.u32 %s177_s19, 4  ;;  %s93_s20 = int_to_ptr.vmem [resolvable:$true] %s92_s20 }
  0x16   :  { %s147_s21 = scalar_lea.vmem %s93_s20, 256  ;;  %p152_p6 = scmp.lt.s32.totalorder %s93_s20, %s93_s20 }
  0x17   :  { %p148_p5 = scmp.ne.s32.totalorder %s93_s20, %s147_s21  ;;  %p153_p7 = scmp.lt.s32.totalorder %s147_s21, %s147_s21 }
  0x19   :  { %41 = vadd.xlane.f32.xlu0 %v38_v1  ;;  %p154_p8 = por %p153_p7, %p152_p6 }
  0x1a   :  { %v73_v26 = vstv %s71_s0 }
  0x1b   :  { %v82_v29 = vstv %s105_s1  ;;  %p155_p9 = pnand %p154_p8, %p148_p5 }
  0x9e   :  { %v40_v2 = vpop.xlane.xlu0 %39 }
  0x9f   :  { %v44_v3 = vmul.f32 0.0078125, %v40_v2 }
  0xa1   :  { %v46_v4 = vsub.f32 %v37_v0, %v44_v3 }
  0xa2   :  { %v42_v5 = vpop.xlane.xlu0 %41 }
  0xa3   :  { %v45_v6 = vmul.f32 0.0078125, %v42_v5  ;;  %v48_v7 = vmul.f32 %v46_v4, %v46_v4  ;;  %v74_v27 = vmul.f32 %v73_v26, %v46_v4 }
  0xa5   :  { %v47_v8 = vsub.f32 %v38_v1, %v45_v6  ;;  %50 = vadd.xlane.f32.xlu1 %v48_v7 }
  0xa7   :  { %v49_v9 = vmul.f32 %v47_v8, %v47_v8  ;;  %v75_v31 = vmul.f32 %v73_v26, %v47_v8 }
  0xa9   :  { %52 = vadd.xlane.f32.xlu1 %v49_v9 }
 0x12e   :  { %v51_v10 = vpop.xlane.xlu1 %50 }
 0x12f   :  { %v55_v11 = vmul.f32 0.007874016, %v51_v10 }
 0x131   :  { %111 = vrsqrt.f32 %v55_v11  ;;  %vm59_vm0 = vcmp.eq.f32.partialorder %v55_v11, inf  ;;  %v62_v16 = vand.u32 2147483648, %v55_v11  ;;  %vm61_vm1 = vcmp.eq.f32.partialorder %v55_v11, 0.0 }
 0x132   :  { %v53_v12 = vpop.xlane.xlu1 %52 }
 0x133   :  { %v56_v13 = vmul.f32 0.007874016, %v53_v12 }
 0x135   :  { %113 = vrsqrt.f32 %v56_v13  ;;  %vm66_vm2 = vcmp.eq.f32.partialorder %v56_v13, inf  ;;  %v69_v22 = vand.u32 2147483648, %v56_v13  ;;  %vm68_vm3 = vcmp.eq.f32.partialorder %v56_v13, 0.0 }
 0x13e   :  { %v112_v14 = vpop.eup %111 }
 0x13f   :  { %v58_v15 = vmul.f32 %v112_v14, %v55_v11 }
 0x141   :  { %v60_v17 = vsel %vm59_vm0, %v55_v11, %v58_v15 }
 0x142   :  { %v114_v18 = vpop.eup %113  ;;  %v63_v19 = vsel %vm61_vm1, %v62_v16, %v60_v17 }
 0x143   :  { %v65_v20 = vmul.f32 %v114_v18, %v56_v13  ;;  %v76_v21 = vadd.f32 1e-06, %v63_v19 }
 0x145   :  { %v67_v23 = vsel %vm66_vm2, %v56_v13, %v65_v20  ;;  %115 = vrcp.f32 %v76_v21 }
 0x146   :  { %v70_v24 = vsel %vm68_vm3, %v69_v22, %v67_v23 }
 0x147   :  { %v77_v25 = vadd.f32 1e-06, %v70_v24 }
 0x149   :  { %117 = vrcp.f32 %v77_v25 }
 0x152   :  { %v116_v28 = vpop.eup %115 }
 0x153   :  { %v79_v30 = vmul.f32 %v116_v28, %v74_v27 }
 0x155   :  { %v83_v32 = vadd.f32 %v82_v29, %v79_v30 }
 0x156   :  { %v118_v33 = vpop.eup %117 }
 0x157   :  { %v81_v34 = vmul.f32 %v118_v33, %v75_v31  ;;  %85 = vst [vmem:[#allocation7] sm:$0xff] %v83_v32 }
 0x159   :  { %v84_v35 = vadd.f32 %v82_v29, %v81_v34 }
 0x15b   :  { %86 = vst [vmem:[#allocation7 + $0x8] sm:$0xff] %v84_v35 }
 0x15c   :  { %158 = shalt.err (!%p155_p9)
}
 0x15d   :  { %98 = dma.vmem_to_hbm [thread:$0]  %s93_s20, 256, %s210_s2, [#allocation4], %s175_s15, %s175_s15, %s176_s16  }
 0x15e   :  { %171 = dma.done.wait [#allocation4], 256  }
 0x15f   :  { %172 = vsyncadd [#allocation4], 4294967040 }
 0x160   :  { %102 = vsyncpa [#allocation3], 1 }
 0x161   :  { %103 = vsyncpa [#allocation4], 1 }
 0x162   :  { %104 = vsyncpa [#allocation5], 1 }

</bundles_post_ra>
